<compile_context>
chip_gen: v7x
topology: tpu7x:2x2x1
jax: 0.10.0
libtpu: 0.0.40
codegen_flags: <defaults>
</compile_context>

<pallas_src>
import functools

import jax
import jax.numpy as jnp
from jax.experimental import pallas as pl
from jax.experimental.pallas import tpu as pltpu


# ----------------------------------------------------------------------------
# Small helpers
# ----------------------------------------------------------------------------
def _round_up(n, m):
    return -(-n // m) * m


def _tpu_topology():
    """Return (generation, tensorcores_per_chip, has_bf16_vpu) from device_kind."""
    try:
        kind = jax.devices()[0].device_kind.lower()
    except Exception:  # no device info available; use conservative defaults
        return None, 1, True
    gen = None
    for g in (7, 6, 5, 4):
        if f"v{g}" in kind:
            gen = g
            break
    num_tc = 2 if (gen is not None and gen >= 7) else 1      # v7x: 2 TCs/chip
    bf16_vpu = (gen is None) or (gen >= 6)                    # v5-class: no bf16 VPU
    return gen, num_tc, bf16_vpu


def _choose_batch_tile(B, num_tc):
    """Batch tile in rows: multiple of 16 (bf16 sublane packing), capped at 512.

    On 2-TensorCore chips the batch is split into >= 2 tiles whenever B >= 16 so
    both cores receive work under dimension_semantics=("parallel",).
    """
    if num_tc >= 2 and B >= 16:
        return max(16, min(512, _round_up(_round_up(B, 2) // 2, 16)))
    return max(16, min(512, _round_up(B, 16)))


@functools.lru_cache(maxsize=1)
def _buffered_supported():
    """Deterministic one-time probe: does this JAX/Mosaic accept pl.Buffered(1)?

    Lowers + compiles a tiny kernel with a single-buffered resident input block.
    This replaces the previous broad try/except around the *executed* call, so
    genuine failures of the real kernel are never silently swallowed.
    """
    if not hasattr(pl, "Buffered"):
        return False

    def _probe(x_ref, o_ref):
        o_ref[...] = x_ref[...] * 2.0

    try:
        fn = pl.pallas_call(
            _probe,
            out_shape=jax.ShapeDtypeStruct((16, 128), jnp.float32),
            grid_spec=pltpu.PrefetchScalarGridSpec(
                num_scalar_prefetch=0,
                grid=(2,),
                in_specs=[pl.BlockSpec((8, 128), lambda i: (0, 0),
                                       pipeline_mode=pl.Buffered(1))],
                out_specs=pl.BlockSpec((8, 128), lambda i: (i, 0)),
            ),
        )
        jax.jit(fn).lower(jax.ShapeDtypeStruct((8, 128), jnp.float32)).compile()
        return True
    except Exception:
        return False


def _resident_spec(shape, single_buffered):
    """BlockSpec for blocks whose index never changes (mask / weights / biases)."""
    if single_buffered:
        return pl.BlockSpec(shape, lambda i: (0, 0), pipeline_mode=pl.Buffered(1))
    return pl.BlockSpec(shape, lambda i: (0, 0))


# ----------------------------------------------------------------------------
# Kernel bodies
# ----------------------------------------------------------------------------
def _bias_relu(h_f32, b_ref, bf16_epilogue):
    """bias-add + ReLU after an f32-accumulated dot; bf16 where the chip has a
    bf16 VPU (halves VPU element-ops and vreg pressure), f32 otherwise.  The
    result is the bf16 operand of the next MXU dot either way."""
    if bf16_epilogue:
        h = jnp.maximum(h_f32.astype(jnp.bfloat16) + b_ref[...], 0)
    else:
        h = jnp.maximum(h_f32 + b_ref[...], 0.0)
    return h.astype(jnp.bfloat16)


def _mlp_heads(mask, z, w1_ref, b1_ref, w2_ref, b2_ref, wts_ref, bts_ref,
               *, c_pad, bf16_epilogue):
    """Shared MLP + fused t/s heads.  bf16 MXU operands, f32 accumulation."""
    masked_z = mask * z                                                  # f32 [Tb, Cp]

    h = jnp.dot(masked_z.astype(jnp.bfloat16), w1_ref[...],
                preferred_element_type=jnp.float32)
    h = _bias_relu(h, b1_ref, bf16_epilogue)
    h = jnp.dot(h, w2_ref[...], preferred_element_type=jnp.float32)
    h = _bias_relu(h, b2_ref, bf16_epilogue)

    # Fused t|s head: one [Tb,H] @ [H,2*Cp] matmul; split at the 128-lane-aligned
    # offset c_pad (no XLU rotate).
    ts = jnp.dot(h, wts_ref[...], preferred_element_type=jnp.float32) + bts_ref[...]
    t_out = ts[:, :c_pad]
    s_out = jnp.tanh(ts[:, c_pad:])
    return masked_z, t_out, s_out


def _coupling_fwd_kernel(mask_ref, z_ref,
                         w1_ref, b1_ref, w2_ref, b2_ref, wts_ref, bts_ref,
                         z_out_ref, ldj_delta_ref, *, c_pad, bf16_epilogue):
    mask = mask_ref[...]                                                 # [1, Cp]
    z = z_ref[...]                                                       # [Tb, Cp]
    masked_z, t_out, s_out = _mlp_heads(
        mask, z, w1_ref, b1_ref, w2_ref, b2_ref, wts_ref, bts_ref,
        c_pad=c_pad, bf16_epilogue=bf16_epilogue)
    inv_mask = 1.0 - mask
    z_out_ref[...] = masked_z + inv_mask * (z * jnp.exp(s_out) + t_out)
    # Only the per-tile ldj delta is emitted; the incoming ldj is added in the
    # wrapper (drops a lane-width-1 input DMA stream + its double buffer).
    ldj_delta_ref[...] = jnp.sum(inv_mask * s_out, axis=1, keepdims=True)


def _coupling_rev_kernel(mask_ref, z_ref,
                         w1_ref, b1_ref, w2_ref, b2_ref, wts_ref, bts_ref,
                         z_out_ref, *, c_pad, bf16_epilogue):
    mask = mask_ref[...]
    z = z_ref[...]
    masked_z, t_out, s_out = _mlp_heads(
        mask, z, w1_ref, b1_ref, w2_ref, b2_ref, wts_ref, bts_ref,
        c_pad=c_pad, bf16_epilogue=bf16_epilogue)
    inv_mask = 1.0 - mask
    z_out_ref[...] = masked_z + inv_mask * ((z - t_out) * jnp.exp(-s_out))
    # Reverse ldj is identically zero in the original module -> produced in the
    # wrapper, no kernel stream.


# ----------------------------------------------------------------------------
# Wrapper
# ----------------------------------------------------------------------------
def coupling_forward(z, ldj, mask, params, *, reverse=False, batch_tile=None):
    """z: [B, C], ldj: [B], mask: [C], params: dict of weights (see init below)."""
    B, C = z.shape
    H = params["w1"].shape[1]

    _, num_tc, bf16_vpu = _tpu_topology()
    bf16_epilogue = bool(bf16_vpu)

    if batch_tile is None:
        batch_tile = _choose_batch_tile(B, num_tc)
    assert batch_tile % 8 == 0, "batch_tile must be a multiple of 8"

    B_pad = _round_up(B, batch_tile)
    num_tiles = B_pad // batch_tile
    C_pad = _round_up(C, 128)           # lane-align the feature dim (and t|s split)

    # ---- pad / cast inputs --------------------------------------------------
    z_in = z.astype(jnp.float32)
    if (B_pad, C_pad) != (B, C):
        z_in = jnp.pad(z_in, ((0, B_pad - B), (0, C_pad - C)))
    mask2 = jnp.pad(mask.reshape(1, C).astype(jnp.float32), ((0, 0), (0, C_pad - C)))

    # ---- pad / cast weights (bf16 MXU operands; biases in epilogue dtype) ----
    ep_dtype = jnp.bfloat16 if bf16_epilogue else jnp.float32
    pad_c_cols = ((0, 0), (0, C_pad - C))
    w1 = jnp.pad(params["w1"].astype(jnp.float32), ((0, C_pad - C), (0, 0))
                 ).astype(jnp.bfloat16)                                   # [Cp, H]
    w2 = params["w2"].astype(jnp.bfloat16)                                # [H, H]
    wts = jnp.concatenate(
        [jnp.pad(params["wt"].astype(jnp.float32), pad_c_cols),
         jnp.pad(params["ws"].astype(jnp.float32), pad_c_cols)],
        axis=1).astype(jnp.bfloat16)                                      # [H, 2*Cp]
    b1 = params["b1"].astype(ep_dtype)                                    # [1, H]
    b2 = params["b2"].astype(ep_dtype)                                    # [1, H]
    bts = jnp.concatenate(
        [jnp.pad(params["bt"].astype(jnp.float32), pad_c_cols),
         jnp.pad(params["bs"].astype(jnp.float32), pad_c_cols)],
        axis=1)                                                           # [1, 2*Cp]

    compiler_params = pltpu.CompilerParams(
        dimension_semantics=("parallel",),       # batch tiles shard across TCs
        vmem_limit_bytes=48 * 1024 * 1024,       # budgeted for v7x's 64 MiB VMEM
    )

    single_buffered = _buffered_supported()
    wspec = lambda shape: _resident_spec(shape, single_buffered)
    weight_specs = [wspec((C_pad, H)), wspec((1, H)),
                    wspec((H, H)), wspec((1, H)),
                    wspec((H, 2 * C_pad)), wspec((1, 2 * C_pad))]

    row_spec = pl.BlockSpec((batch_tile, C_pad), lambda i: (i, 0))
    ldj_spec = pl.BlockSpec((batch_tile, 1), lambda i: (i, 0))

    if not reverse:
        kernel = functools.partial(_coupling_fwd_kernel, c_pad=C_pad,
                                   bf16_epilogue=bf16_epilogue)
        in_specs = [wspec((1, C_pad)), row_spec] + weight_specs
        out_shape = (jax.ShapeDtypeStruct((B_pad, C_pad), jnp.float32),
                     jax.ShapeDtypeStruct((B_pad, 1), jnp.float32))
        out_specs = (row_spec, ldj_spec)
    else:
        kernel = functools.partial(_coupling_rev_kernel, c_pad=C_pad,
                                   bf16_epilogue=bf16_epilogue)
        in_specs = [wspec((1, C_pad)), row_spec] + weight_specs
        out_shape = jax.ShapeDtypeStruct((B_pad, C_pad), jnp.float32)
        out_specs = row_spec

    outs = pl.pallas_call(
        kernel,
        out_shape=out_shape,
        grid_spec=pltpu.PrefetchScalarGridSpec(
            num_scalar_prefetch=0,
            grid=(num_tiles,),
            in_specs=in_specs,
            out_specs=out_specs,
        ),
        compiler_params=compiler_params,
    )(mask2, z_in, w1, b1, w2, b2, wts, bts)

    if not reverse:
        z_out, ldj_delta = outs
        return z_out[:B, :C], ldj.astype(jnp.float32) + ldj_delta[:B, 0]
    return outs[:B, :C], jnp.zeros_like(ldj)


# ----------------------------------------------------------------------------
# Parameter construction (mirrors Coupling.__init__) + test-only head randomizer
# ----------------------------------------------------------------------------
def init_coupling_params(key, c_in, n_hidden):
    k1, k2 = jax.random.split(key, 2)

    def linear(k, fan_in, fan_out):
        # PyTorch default nn.Linear init: U(-1/sqrt(fan_in), 1/sqrt(fan_in)).
        bound = 1.0 / jnp.sqrt(fan_in)
        kw, kb = jax.random.split(k)
        w = jax.random.uniform(kw, (fan_in, fan_out), jnp.float32, -bound, bound)
        b = jax.random.uniform(kb, (1, fan_out), jnp.float32, -bound, bound)
        return w, b

    w1, b1 = linear(k1, c_in, n_hidden)
    w2, b2 = linear(k2, n_hidden, n_hidden)
    # t and s[0] weights/biases are zero-initialized in the module.
    wt = jnp.zeros((n_hidden, c_in), jnp.float32)
    bt = jnp.zeros((1, c_in), jnp.float32)
    ws = jnp.zeros((n_hidden, c_in), jnp.float32)
    bs = jnp.zeros((1, c_in), jnp.float32)
    return dict(w1=w1, b1=b1, w2=w2, b2=b2, wt=wt, bt=bt, ws=ws, bs=bs)


def randomize_heads(key, params, scale=0.1):
    """Non-zero t/s heads so the affine/exp/tanh math is actually exercised."""
    kt, ks, kbt, kbs = jax.random.split(key, 4)
    H, C = params["wt"].shape
    p = dict(params)
    p["wt"] = jax.random.uniform(kt, (H, C), jnp.float32, -scale, scale)
    p["ws"] = jax.random.uniform(ks, (H, C), jnp.float32, -scale, scale)
    p["bt"] = jax.random.uniform(kbt, (1, C), jnp.float32, -scale, scale)
    p["bs"] = jax.random.uniform(kbs, (1, C), jnp.float32, -scale, scale)
    return p


# ----------------------------------------------------------------------------
# Pure-JAX f32 reference (for verification)
# ----------------------------------------------------------------------------
def coupling_forward_ref(z, ldj, mask, p, reverse=False):
    mask = mask.reshape(1, -1)
    masked_z = mask * z
    h = jnp.maximum(masked_z @ p["w1"] + p["b1"], 0.0)
    h = jnp.maximum(h @ p["w2"] + p["b2"], 0.0)
    t = h @ p["wt"] + p["bt"]
    s = jnp.tanh(h @ p["ws"] + p["bs"])
    inv = 1.0 - mask
    if not reverse:
        z_out = masked_z + inv * (z * jnp.exp(s) + t)
        ldj_out = ldj + jnp.sum(inv * s, axis=1)
    else:
        z_out = masked_z + inv * ((z - t) * jnp.exp(-s))
        ldj_out = jnp.zeros_like(ldj)
    return z_out, ldj_out


if __name__ == "__main__":
    key = jax.random.PRNGKey(0)
    kz, kl, kp, kh = jax.random.split(key, 4)

    B, C, H = 8, 16, 128
    z = jax.random.normal(kz, (B, C), jnp.float32)
    ldj = jax.random.normal(kl, (B,), jnp.float32)
    mask = (jnp.arange(C) % 2).astype(jnp.float32)   # checkerboard mask over features
    params0 = init_coupling_params(kp, C, H)

    # 1) module-init params (zero t/s heads): outputs must equal (z, ldj) exactly.
    z_out, ldj_out = coupling_forward(z, ldj, mask, params0, reverse=False)
    jax.block_until_ready((z_out, ldj_out))
    assert jnp.allclose(z_out, z, atol=1e-6), "zero-init z mismatch"
    assert jnp.allclose(ldj_out, ldj, atol=1e-6), "zero-init ldj mismatch"

    # 2) randomized heads, multi-tile grid (batch_tile=8 -> grid of 4), fwd + rev.
    #    bf16 MXU operands (+ bf16 epilogue on v6e/v7x) -> loosened tolerance.
    B2 = 32
    z2 = jax.random.normal(jax.random.fold_in(kz, 1), (B2, C), jnp.float32)
    ldj2 = jax.random.normal(jax.random.fold_in(kl, 1), (B2,), jnp.float32)
    params = randomize_heads(kh, params0)

    z_k, ldj_k = coupling_forward(z2, ldj2, mask, params, reverse=False, batch_tile=8)
    jax.block_until_ready((z_k, ldj_k))
    z_r, ldj_r = coupling_forward_ref(z2, ldj2, mask, params, reverse=False)
    assert jnp.allclose(z_k, z_r, atol=5e-2), "forward z mismatch"
    assert jnp.allclose(ldj_k, ldj_r, atol=5e-2), "forward ldj mismatch"

    z_rk, ldj_rk = coupling_forward(z2, ldj2, mask, params, reverse=True, batch_tile=8)
    jax.block_until_ready((z_rk, ldj_rk))
    z_rr, ldj_rr = coupling_forward_ref(z2, ldj2, mask, params, reverse=True)
    assert jnp.allclose(z_rk, z_rr, atol=5e-2), "reverse z mismatch"
    assert jnp.allclose(ldj_rk, ldj_rr, atol=1e-6), "reverse ldj mismatch"

    # 3) batch not a multiple of the tile (exercises zero-padding + slice path,
    #    default batch_tile selection, and chip-dependent tiling).
    B3 = 10
    z3 = jax.random.normal(jax.random.fold_in(kz, 2), (B3, C), jnp.float32)
    ldj3 = jax.random.normal(jax.random.fold_in(kl, 2), (B3,), jnp.float32)
    z3_k, ldj3_k = coupling_forward(z3, ldj3, mask, params, reverse=False)
    jax.block_until_ready((z3_k, ldj3_k))
    z3_r, ldj3_r = coupling_forward_ref(z3, ldj3, mask, params, reverse=False)
    assert jnp.allclose(z3_k, z3_r, atol=5e-2), "padded-batch z mismatch"
    assert jnp.allclose(ldj3_k, ldj3_r, atol=5e-2), "padded-batch ldj mismatch"

    print("KERNEL_OK")
</pallas_src>

<mosaic_0001>
module attributes {stable_mosaic.version = 11 : i64} {
  func.func @_coupling_fwd_kernel(%arg0: i32, %arg1: memref<1x128xf32, #tpu.memory_space<vmem>>, %arg2: memref<16x128xf32, #tpu.memory_space<vmem>>, %arg3: memref<128x128xbf16, #tpu.memory_space<vmem>>, %arg4: memref<1x128xbf16, #tpu.memory_space<vmem>>, %arg5: memref<128x128xbf16, #tpu.memory_space<vmem>>, %arg6: memref<1x128xbf16, #tpu.memory_space<vmem>>, %arg7: memref<128x256xbf16, #tpu.memory_space<vmem>>, %arg8: memref<1x256xf32, #tpu.memory_space<vmem>>, %arg9: memref<16x128xf32, #tpu.memory_space<vmem>>, %arg10: memref<16x1xf32, #tpu.memory_space<vmem>>) attributes {dimension_semantics = [#tpu.dimension_semantics<parallel>], iteration_bounds = array<i64: 1>, scalar_prefetch = 0 : i64, scratch_operands = 0 : i64, tpu.core_type = #tpu.core_type<tc>, window_params = [{pipeline_mode = #tpu.pipeline_mode<synchronous>, transform_indices = @transform_0, window_bounds = array<i64: 1, 128>}, {transform_indices = @transform_1, window_bounds = array<i64: 16, 128>}, {pipeline_mode = #tpu.pipeline_mode<synchronous>, transform_indices = @transform_2, window_bounds = array<i64: 128, 128>}, {pipeline_mode = #tpu.pipeline_mode<synchronous>, transform_indices = @transform_3, window_bounds = array<i64: 1, 128>}, {pipeline_mode = #tpu.pipeline_mode<synchronous>, transform_indices = @transform_4, window_bounds = array<i64: 128, 128>}, {pipeline_mode = #tpu.pipeline_mode<synchronous>, transform_indices = @transform_5, window_bounds = array<i64: 1, 128>}, {pipeline_mode = #tpu.pipeline_mode<synchronous>, transform_indices = @transform_6, window_bounds = array<i64: 128, 256>}, {pipeline_mode = #tpu.pipeline_mode<synchronous>, transform_indices = @transform_7, window_bounds = array<i64: 1, 256>}, {transform_indices = @transform_8, window_bounds = array<i64: 16, 128>}, {transform_indices = @transform_9, window_bounds = array<i64: 16, 1>}]} {
    %c0 = arith.constant 0 : index
    %c0_0 = arith.constant 0 : index
    %0 = vector.load %arg1[%c0, %c0_0] : memref<1x128xf32, #tpu.memory_space<vmem>>, vector<1x128xf32>
    %c0_1 = arith.constant 0 : index
    %c0_2 = arith.constant 0 : index
    %1 = vector.load %arg2[%c0_1, %c0_2] : memref<16x128xf32, #tpu.memory_space<vmem>>, vector<16x128xf32>
    %2 = vector.broadcast %0 : vector<1x128xf32> to vector<16x128xf32>
    %3 = arith.mulf %2, %1 : vector<16x128xf32>
    %4 = arith.truncf %3 : vector<16x128xf32> to vector<16x128xbf16>
    %c0_3 = arith.constant 0 : index
    %c0_4 = arith.constant 0 : index
    %5 = vector.load %arg3[%c0_3, %c0_4] : memref<128x128xbf16, #tpu.memory_space<vmem>>, vector<128x128xbf16>
    %cst = arith.constant dense<0.000000e+00> : vector<16x128xf32>
    %6 = tpu.matmul %4, %5, %cst {dimension_numbers = #tpu.dot_dimension_numbers<[1], [0], [0], [1], [0, 0, 1, 1], [], []>} : vector<16x128xbf16>, vector<128x128xbf16>, vector<16x128xf32> -> vector<16x128xf32>
    %7 = arith.truncf %6 : vector<16x128xf32> to vector<16x128xbf16>
    %c0_5 = arith.constant 0 : index
    %c0_6 = arith.constant 0 : index
    %8 = vector.load %arg4[%c0_5, %c0_6] : memref<1x128xbf16, #tpu.memory_space<vmem>>, vector<1x128xbf16>
    %9 = vector.broadcast %8 : vector<1x128xbf16> to vector<16x128xbf16>
    %10 = arith.addf %7, %9 : vector<16x128xbf16>
    %cst_7 = arith.constant 0.000000e+00 : bf16
    %11 = vector.broadcast %cst_7 : bf16 to vector<16x128xbf16>
    %12 = arith.maximumf %10, %11 : vector<16x128xbf16>
    %c0_8 = arith.constant 0 : index
    %c0_9 = arith.constant 0 : index
    %13 = vector.load %arg5[%c0_8, %c0_9] : memref<128x128xbf16, #tpu.memory_space<vmem>>, vector<128x128xbf16>
    %cst_10 = arith.constant dense<0.000000e+00> : vector<16x128xf32>
    %14 = tpu.matmul %12, %13, %cst_10 {dimension_numbers = #tpu.dot_dimension_numbers<[1], [0], [0], [1], [0, 0, 1, 1], [], []>} : vector<16x128xbf16>, vector<128x128xbf16>, vector<16x128xf32> -> vector<16x128xf32>
    %15 = arith.truncf %14 : vector<16x128xf32> to vector<16x128xbf16>
    %c0_11 = arith.constant 0 : index
    %c0_12 = arith.constant 0 : index
    %16 = vector.load %arg6[%c0_11, %c0_12] : memref<1x128xbf16, #tpu.memory_space<vmem>>, vector<1x128xbf16>
    %17 = vector.broadcast %16 : vector<1x128xbf16> to vector<16x128xbf16>
    %18 = arith.addf %15, %17 : vector<16x128xbf16>
    %cst_13 = arith.constant 0.000000e+00 : bf16
    %19 = vector.broadcast %cst_13 : bf16 to vector<16x128xbf16>
    %20 = arith.maximumf %18, %19 : vector<16x128xbf16>
    %c0_14 = arith.constant 0 : index
    %c0_15 = arith.constant 0 : index
    %21 = vector.load %arg7[%c0_14, %c0_15] : memref<128x256xbf16, #tpu.memory_space<vmem>>, vector<128x256xbf16>
    %cst_16 = arith.constant dense<0.000000e+00> : vector<16x256xf32>
    %22 = tpu.matmul %20, %21, %cst_16 {dimension_numbers = #tpu.dot_dimension_numbers<[1], [0], [0], [1], [0, 0, 1, 1], [], []>} : vector<16x128xbf16>, vector<128x256xbf16>, vector<16x256xf32> -> vector<16x256xf32>
    %c0_17 = arith.constant 0 : index
    %c0_18 = arith.constant 0 : index
    %23 = vector.load %arg8[%c0_17, %c0_18] : memref<1x256xf32, #tpu.memory_space<vmem>>, vector<1x256xf32>
    %24 = vector.broadcast %23 : vector<1x256xf32> to vector<16x256xf32>
    %25 = arith.addf %22, %24 : vector<16x256xf32>
    %26 = vector.extract_strided_slice %25 {offsets = [0, 0], sizes = [16, 128], strides = [1, 1]} : vector<16x256xf32> to vector<16x128xf32>
    %27 = vector.extract_strided_slice %25 {offsets = [0, 128], sizes = [16, 128], strides = [1, 1]} : vector<16x256xf32> to vector<16x128xf32>
    %28 = math.tanh %27 : vector<16x128xf32>
    %cst_19 = arith.constant 1.000000e+00 : f32
    %29 = vector.broadcast %cst_19 : f32 to vector<1x128xf32>
    %30 = arith.subf %29, %0 : vector<1x128xf32>
    %31 = math.exp %28 : vector<16x128xf32>
    %32 = arith.mulf %1, %31 : vector<16x128xf32>
    %33 = arith.addf %32, %26 : vector<16x128xf32>
    %34 = vector.broadcast %30 : vector<1x128xf32> to vector<16x128xf32>
    %35 = arith.mulf %34, %33 : vector<16x128xf32>
    %36 = arith.addf %3, %35 : vector<16x128xf32>
    %c0_20 = arith.constant 0 : index
    %c0_21 = arith.constant 0 : index
    %37 = vector.load %arg9[%c0_20, %c0_21] : memref<16x128xf32, #tpu.memory_space<vmem>>, vector<16x128xf32>
    tpu.vector_store %arg9[%c0_20, %c0_21], %36 {strides = array<i32>} : memref<16x128xf32, #tpu.memory_space<vmem>>, vector<16x128xf32>,
    %38 = vector.broadcast %30 : vector<1x128xf32> to vector<16x128xf32>
    %39 = arith.mulf %38, %28 : vector<16x128xf32>
    %cst_22 = arith.constant dense<0.000000e+00> : vector<16xf32>
    %40 = vector.multi_reduction <add>, %39, %cst_22 [1] : vector<16x128xf32> to vector<16xf32>
    %41 = vector.shape_cast %40 : vector<16xf32> to vector<16x1xf32>
    %c0_23 = arith.constant 0 : index
    %c0_24 = arith.constant 0 : index
    %42 = vector.load %arg10[%c0_23, %c0_24] : memref<16x1xf32, #tpu.memory_space<vmem>>, vector<16x1xf32>
    tpu.vector_store %arg10[%c0_23, %c0_24], %41 {strides = array<i32>} : memref<16x1xf32, #tpu.memory_space<vmem>>, vector<16x1xf32>,
    return
  }
  func.func @transform_0(%arg0: i32) -> (i32, i32) {
    %c0_i32 = arith.constant 0 : i32
    %c0_i32_0 = arith.constant 0 : i32
    %c0_i32_1 = arith.constant 0 : i32
    return %c0_i32, %c0_i32_0 : i32, i32
  }
  func.func @transform_1(%arg0: i32) -> (i32, i32) {
    %c0_i32 = arith.constant 0 : i32
    %c0_i32_0 = arith.constant 0 : i32
    return %arg0, %c0_i32 : i32, i32
  }
  func.func @transform_2(%arg0: i32) -> (i32, i32) {
    %c0_i32 = arith.constant 0 : i32
    %c0_i32_0 = arith.constant 0 : i32
    %c0_i32_1 = arith.constant 0 : i32
    return %c0_i32, %c0_i32_0 : i32, i32
  }
  func.func @transform_3(%arg0: i32) -> (i32, i32) {
    %c0_i32 = arith.constant 0 : i32
    %c0_i32_0 = arith.constant 0 : i32
    %c0_i32_1 = arith.constant 0 : i32
    return %c0_i32, %c0_i32_0 : i32, i32
  }
  func.func @transform_4(%arg0: i32) -> (i32, i32) {
    %c0_i32 = arith.constant 0 : i32
    %c0_i32_0 = arith.constant 0 : i32
    %c0_i32_1 = arith.constant 0 : i32
    return %c0_i32, %c0_i32_0 : i32, i32
  }
  func.func @transform_5(%arg0: i32) -> (i32, i32) {
    %c0_i32 = arith.constant 0 : i32
    %c0_i32_0 = arith.constant 0 : i32
    %c0_i32_1 = arith.constant 0 : i32
    return %c0_i32, %c0_i32_0 : i32, i32
  }
  func.func @transform_6(%arg0: i32) -> (i32, i32) {
    %c0_i32 = arith.constant 0 : i32
    %c0_i32_0 = arith.constant 0 : i32
    %c0_i32_1 = arith.constant 0 : i32
    return %c0_i32, %c0_i32_0 : i32, i32
  }
  func.func @transform_7(%arg0: i32) -> (i32, i32) {
    %c0_i32 = arith.constant 0 : i32
    %c0_i32_0 = arith.constant 0 : i32
    %c0_i32_1 = arith.constant 0 : i32
    return %c0_i32, %c0_i32_0 : i32, i32
  }
  func.func @transform_8(%arg0: i32) -> (i32, i32) {
    %c0_i32 = arith.constant 0 : i32
    %c0_i32_0 = arith.constant 0 : i32
    return %arg0, %c0_i32 : i32, i32
  }
  func.func @transform_9(%arg0: i32) -> (i32, i32) {
    %c0_i32 = arith.constant 0 : i32
    %c0_i32_0 = arith.constant 0 : i32
    return %arg0, %c0_i32 : i32, i32
  }
}

</mosaic_0001>

<bundles_post_ra>
// kernel: tpu_custom_call.1
= control target key start
LH: loop header
LB: loop body
LE: loop exit
PB: predicated region body
PF: predicated region fallthrough
CT: control target
= control target key end

     0   :  { %15 = vsyncpa [#allocation3], 0  ;;  %s1036_s0 = inlined_call_operand.hbm [shape: f32[1,128], index: 0, kind: input, shape index: {}]   ;;  %s1037_s1 = inlined_call_operand.hbm [shape: f32[16,128], index: 1, kind: input, shape index: {}]   ;;  %s1038_s2 = inlined_call_operand.hbm [shape: bf16[128,128], index: 2, kind: input, shape index: {}]   ;;  %s1039_s3 = inlined_call_operand.vmem [shape: bf16[1,128], index: 3, kind: input, shape index: {}]   ;;  %s1040_s4 = inlined_call_operand.hbm [shape: bf16[128,128], index: 4, kind: input, shape index: {}]   ;;  %s1041_s5 = inlined_call_operand.vmem [shape: bf16[1,128], index: 5, kind: input, shape index: {}]   ;;  %s1042_s6 = inlined_call_operand.hbm [shape: bf16[128,256], index: 6, kind: input, shape index: {}]   ;;  %s1043_s7 = inlined_call_operand.vmem [shape: f32[1,256], index: 7, kind: input, shape index: {}]   ;;  %s1044_s8 = inlined_call_operand.hbm [shape: f32[16,128], index: 8, kind: output, shape index: {0}]   ;;  %s1045_s9 = inlined_call_operand.vmem [shape: f32[16,1], index: 9, kind: output, shape index: {1}]  }
   0x1   :  { %16 = vsyncpa [#allocation6], 0 }
   0x2   :  { %17 = vsyncpa [#allocation9], 0 }
   0x3   :  { %18 = vsyncpa [#allocation4], 0  ;;  %s840_s30 = smov [#allocation5]   ;;  %s700_s13 = scalar_lea.hbm %s1037_s1, 256 }
   0x4   :  { %s34_s10 = sshll.u32 %s840_s30, 4  ;;  %p701_p0 = scmp.ne.s32.totalorder %s1037_s1, %s700_s13  ;;  %s35_s10 = int_to_ptr.vmem [resolvable:$true] %s34_s10 }
   0x5   :  { %p704_p1 = scmp.lt.u32.totalorder %s700_s13, %s1037_s1 }
   0x7   :  { %p706_p2 = pnand %p704_p1, %p701_p0 }
   0x9   :  { %709 = shalt.err (!%p706_p2)
}
   0xa   :  { %s710_s18 = scalar_lea.vmem %s35_s10, 256  ;;  %p715_p4 = scmp.lt.s32.totalorder %s35_s10, %s35_s10 }
   0xb   :  { %p711_p3 = scmp.ne.s32.totalorder %s35_s10, %s710_s18  ;;  %p716_p5 = scmp.lt.s32.totalorder %s710_s18, %s710_s18 }
   0xd   :  { %p717_p6 = por %p716_p5, %p715_p4 }
   0xf   :  { %p718_p7 = pnand %p717_p6, %p711_p3 }
  0x11   :  { %721 = shalt.err (!%p718_p7)
}
  0x12   :  { %s841_s19 = smov 128   ;;  %s842_s20 = smov 8  }
  0x13   :  { %40 = dma.hbm_to_vmem [thread:$0]  %s1037_s1, 256, %s35_s10, [#allocation6], %s841_s19, %s841_s19, %s842_s20  }
  0x14   :  { %s843_s23 = smov [#allocation8]   ;;  %s844_s25 = smov [#allocation2]  }
  0x15   :  { %s60_s24 = sshll.u32 %s843_s23, 4  ;;  %s25_s26 = sshll.u32 %s844_s25, 4  ;;  %s61_s24 = int_to_ptr.vmem [resolvable:$true] %s60_s24  ;;  %s26_s26 = int_to_ptr.vmem [resolvable:$true] %s25_s26 }
  0x16   :  { %s722_s29 = scalar_lea.hbm %s1040_s4, 1024 }
  0x17   :  { %p723_p8 = scmp.ne.s32.totalorder %s1040_s4, %s722_s29  ;;  %p726_p9 = scmp.lt.u32.totalorder %s722_s29, %s1040_s4 }
  0x19   :  { %p728_p10 = pnand %p726_p9, %p723_p8 }
  0x1b   :  { %731 = shalt.err (!%p728_p10)
}
  0x1c   :  { %s732_s1 = scalar_lea.vmem %s61_s24, 1024  ;;  %p737_p12 = scmp.lt.s32.totalorder %s61_s24, %s61_s24 }
  0x1d   :  { %p733_p11 = scmp.ne.s32.totalorder %s61_s24, %s732_s1  ;;  %p738_p13 = scmp.lt.s32.totalorder %s732_s1, %s732_s1 }
  0x1f   :  { %p739_p0 = por %p738_p13, %p737_p12 }
  0x21   :  { %p740_p1 = pnand %p739_p0, %p733_p11 }
  0x23   :  { %743 = shalt.err (!%p740_p1)
}
  0x24   :  { %s845_s10 = smov 64   ;;  %s846_s14 = smov 4  }
  0x25   :  { %66 = dma.hbm_to_vmem [thread:$0]  %s1040_s4, 1024, %s61_s24, [#allocation9], %s845_s10, %s845_s10, %s846_s14  }
  0x26   :  { %s744_s21 = scalar_lea.hbm %s1036_s0, 16 }
  0x27   :  { %p745_p2 = scmp.ne.s32.totalorder %s1036_s0, %s744_s21  ;;  %p748_p3 = scmp.lt.u32.totalorder %s744_s21, %s1036_s0 }
  0x29   :  { %p750_p4 = pnand %p748_p3, %p745_p2 }
  0x2b   :  { %753 = shalt.err (!%p750_p4)
}
  0x2c   :  { %s754_s28 = scalar_lea.vmem %s26_s26, 16  ;;  %s758_s29 = scalar_lea.vmem %s26_s26, 32 }
  0x2d   :  { %p755_p5 = scmp.ne.s32.totalorder %s26_s26, %s754_s28  ;;  %p759_p6 = scmp.lt.s32.totalorder %s26_s26, %s26_s26 }
  0x2e   :  { %p760_p7 = scmp.lt.s32.totalorder %s758_s29, %s754_s28 }
  0x30   :  { %p761_p8 = por %p760_p7, %p759_p6 }
  0x32   :  { %p762_p9 = pnand %p761_p8, %p755_p5 }
  0x34   :  { %765 = shalt.err (!%p762_p9)
}
  0x35   :  { %28 = dma.hbm_to_vmem [thread:$0]  %s1036_s0, 16, %s26_s26, [#allocation3]  }
  0x36   :  { %s847_s30 = smov [#allocation7]   ;;  %s848_s12 = smov [#allocation10]  }
  0x37   :  { %s46_s11 = sshll.u32 %s847_s30, 4  ;;  %s74_s13 = sshll.u32 %s848_s12, 4  ;;  %s47_s11 = int_to_ptr.vmem [resolvable:$true] %s46_s11  ;;  %s75_s13 = int_to_ptr.vmem [resolvable:$true] %s74_s13 }
  0x38   :  { %s766_s16 = scalar_lea.hbm %s1038_s2, 1024 }
  0x39   :  { %p767_p10 = scmp.ne.s32.totalorder %s1038_s2, %s766_s16  ;;  %p770_p11 = scmp.lt.u32.totalorder %s766_s16, %s1038_s2 }
  0x3b   :  { %p772_p12 = pnand %p770_p11, %p767_p10 }
  0x3d   :  { %775 = shalt.err (!%p772_p12)
}
  0x3e   :  { %s776_s0 = scalar_lea.vmem %s47_s11, 1024  ;;  %p781_p0 = scmp.lt.s32.totalorder %s47_s11, %s47_s11 }
  0x3f   :  { %p777_p13 = scmp.ne.s32.totalorder %s47_s11, %s776_s0  ;;  %p782_p1 = scmp.lt.s32.totalorder %s776_s0, %s776_s0 }
  0x41   :  { %p783_p2 = por %p782_p1, %p781_p0 }
  0x43   :  { %p784_p3 = pnand %p783_p2, %p777_p13 }
  0x45   :  { %787 = shalt.err (!%p784_p3)
}
  0x46   :  { %52 = dma.hbm_to_vmem [thread:$0]  %s1038_s2, 1024, %s47_s11, [#allocation6], %s845_s10, %s845_s10, %s846_s14  }
  0x47   :  { %s788_s28 = scalar_lea.hbm %s1042_s6, 2048 }
  0x48   :  { %p789_p4 = scmp.ne.s32.totalorder %s1042_s6, %s788_s28  ;;  %p792_p5 = scmp.lt.u32.totalorder %s788_s28, %s1042_s6 }
  0x4a   :  { %p794_p6 = pnand %p792_p5, %p789_p4 }
  0x4c   :  { %797 = shalt.err (!%p794_p6)
}
  0x4d   :  { %s798_s12 = scalar_lea.vmem %s75_s13, 2048  ;;  %p803_p8 = scmp.lt.s32.totalorder %s75_s13, %s75_s13 }
  0x4e   :  { %p799_p7 = scmp.ne.s32.totalorder %s75_s13, %s798_s12  ;;  %p804_p9 = scmp.lt.s32.totalorder %s798_s12, %s798_s12 }
  0x50   :  { %p805_p10 = por %p804_p9, %p803_p8 }
  0x52   :  { %p806_p11 = pnand %p805_p10, %p799_p7 }
  0x54   :  { %809 = shalt.err (!%p806_p11)
}
  0x55   :  { %80 = dma.hbm_to_vmem [thread:$0]  %s1042_s6, 2048, %s75_s13, [#allocation9], %s841_s19, %s841_s19, %s842_s20  }
  0x56   :  { %832 = dma.done.wait [#allocation3], 16  }
  0x57   :  { %833 = vsyncadd [#allocation3], 4294967280 }
  0x58   :  { %834 = dma.done.wait [#allocation6], 1280  }
  0x59   :  { %835 = vsyncadd [#allocation6], 4294966016 }
  0x5a   :  { %836 = dma.done.wait [#allocation9], 3072  }
  0x5b   :  { %837 = vsyncadd [#allocation9], 4294964224  ;;  %v849_v0 = vmov 0.0   ;;  %vm850_vm0 = vmmov 0   ;;  %v652_v1 = vld [vmem:[#allocation7] sm:$0xff]   ;;  %v653_v2 = vld [vmem:[#allocation7 + $0x8] sm:$0xff]   ;;  %v103_v4 = vlaneseq }
  0x5c   :  { %599 = vmatprep.subr.bf16.mxu0 %v849_v0  ;;  %615 = vmatprep.mubr.msk.bf16.mxu0 %vm850_vm0, %v849_v0  ;;  %v654_v3 = vld [vmem:[#allocation7 + $0x10] sm:$0xff]   ;;  %v660_v5 = vld [vmem:[#allocation8] sm:$0xff]   ;;  %v655_v6 = vld [vmem:[#allocation7 + $0x18] sm:$0xff]   ;;  %v851_v27 = vmov 0  }
  0x5d   :  { %619 = vmatprep.subr.bf16.mxu1 %v849_v0  ;;  %635 = vmatprep.mubr.msk.bf16.mxu1 %vm850_vm0, %v849_v0  ;;  %v661_v7 = vld [vmem:[#allocation8 + $0x8] sm:$0xff]   ;;  %v656_v8 = vld [vmem:[#allocation7 + $0x20] sm:$0xff]   ;;  %v975_v9 = vshrl.u32 %v103_v4, 7  ;;  %v662_v10 = vld [vmem:[#allocation8 + $0x10] sm:$0xff]  }
  0x5e   :  { %600 = vmatpush3.bf16.msra.mxu0 %v652_v1  ;;  %620 = vmatpush3.bf16.msra.mxu1 %v660_v5  ;;  %v657_v11 = vld [vmem:[#allocation7 + $0x28] sm:$0xff]   ;;  %v663_v14 = vld [vmem:[#allocation8 + $0x18] sm:$0xff]   ;;  %v658_v16 = vld [vmem:[#allocation7 + $0x30] sm:$0xff]  }
  0x5f   :  { %601 = vmatprep.subr.bf16.mxu0 %v849_v0  ;;  %621 = vmatprep.subr.bf16.mxu1 %v849_v0  ;;  %v977_v12 = vld [vmem:[#allocation2] sm:$0x1]  ;;  %v980_v13 = vsub.s32 0, %v975_v9  ;;  %v984_v17 = vld [vmem:[#allocation5] sm:$0xff]  ;;  %v986_v18 = vld [vmem:[#allocation5 + $0x8] sm:$0xff] }
  0x60   :  { %v664_v19 = vld [vmem:[#allocation8 + $0x20] sm:$0xff]   ;;  %v659_v22 = vld [vmem:[#allocation7 + $0x38] sm:$0xff]   ;;  %v665_v23 = vld [vmem:[#allocation8 + $0x28] sm:$0xff]  }
  0x61   :  { %v106_v15 = vrot.slane %v977_v12, %v980_v13  ;;  %v666_v25 = vld [vmem:[#allocation8 + $0x30] sm:$0xff]   ;;  %v667_v26 = vld [vmem:[#allocation8 + $0x38] sm:$0xff]   ;;  %v668_v28 = vld [vmem:[#allocation10] ss:$8 sps:$4 sm:$0xff]  }
  0x62   :  { %602 = vmatpush3.bf16.msra.mxu0 %v653_v2  ;;  %622 = vmatpush3.bf16.msra.mxu1 %v661_v7  ;;  %v670_v29 = vld [vmem:[#allocation10 + $0x4] ss:$8 sps:$4 sm:$0xff]   ;;  %v673_v30 = vld [vmem:[#allocation10 + $0x14] ss:$8 sps:$4 sm:$0xff]   ;;  %v671_v31 = vld [vmem:[#allocation10 + $0x10] ss:$8 sps:$4 sm:$0xff]  }
  0x63   :  { %603 = vmatprep.subr.bf16.mxu0 %v849_v0  ;;  %623 = vmatprep.subr.bf16.mxu1 %v849_v0  ;;  %v989_v20 = vmul.f32 %v106_v15, %v984_v17  ;;  %v992_v21 = vmul.f32 %v106_v15, %v986_v18  ;;  %v676_v32 = vld [vmem:[#allocation10 + $0x24] ss:$8 sps:$4 sm:$0xff]   ;;  %v674_v33 = vld [vmem:[#allocation10 + $0x20] ss:$8 sps:$4 sm:$0xff]   ;;  %v679_v34 = vld [vmem:[#allocation10 + $0x34] ss:$8 sps:$4 sm:$0xff]  }
  0x64   :  { %v677_v35 = vld [vmem:[#allocation10 + $0x30] ss:$8 sps:$4 sm:$0xff]   ;;  %v682_v36 = vld [vmem:[#allocation10 + $0x44] ss:$8 sps:$4 sm:$0xff]   ;;  %v680_v37 = vld [vmem:[#allocation10 + $0x40] ss:$8 sps:$4 sm:$0xff]  }
  0x65   :  { %v110_v24 = vpack.c.bf16 %v992_v21, %v989_v20  ;;  %v685_v38 = vld [vmem:[#allocation10 + $0x54] ss:$8 sps:$4 sm:$0xff]   ;;  %v683_v39 = vld [vmem:[#allocation10 + $0x50] ss:$8 sps:$4 sm:$0xff]   ;;  %v217_v40 = vld [vmem:[%s1039_s3] sm:$0x1] }
  0x66   :  { %604 = vmatpush3.bf16.msra.mxu0 %v654_v3  ;;  %624 = vmatpush3.bf16.msra.mxu1 %v662_v10  ;;  %v219_v41 = vpack.i.b16 %v217_v40, %v217_v40  ;;  %v688_v50 = vld [vmem:[#allocation10 + $0x64] ss:$8 sps:$4 sm:$0xff]   ;;  %v686_v51 = vld [vmem:[#allocation10 + $0x60] ss:$8 sps:$4 sm:$0xff]   ;;  %v691_v52 = vld [vmem:[#allocation10 + $0x74] ss:$8 sps:$4 sm:$0xff]  }
  0x67   :  { %605 = vmatprep.subr.bf16.mxu0 %v849_v0  ;;  %625 = vmatprep.subr.bf16.mxu1 %v849_v0  ;;  %v689_v53 = vld [vmem:[#allocation10 + $0x70] ss:$8 sps:$4 sm:$0xff]   ;;  %v333_v54 = vld [vmem:[%s1041_s5] sm:$0x1]  ;;  %v496_v10 = vsub.f32 1.0, %v977_v12  ;;  %s852_s5 = smov [#allocation11]  }
  0x68   :  { %v224_v44 = vrot.slane %v219_v41, %v980_v13  ;;  %v335_v55 = vpack.i.b16 %v333_v54, %v333_v54  ;;  %v359_v1 = vld [vmem:[%s1043_s7] sm:$0x3]  ;;  %s531_s7 = sshll.u32 %s852_s5, 4  ;;  %s532_s7 = int_to_ptr.vmem [resolvable:$true] %s531_s7 }
  0x69   :  { %s810_s15 = scalar_lea.vmem %s532_s7, 256  ;;  %p815_p13 = scmp.lt.s32.totalorder %s532_s7, %s532_s7 }
  0x6a   :  { %606 = vmatpush3.bf16.msra.mxu0 %v655_v6  ;;  %626 = vmatpush3.bf16.msra.mxu1 %v663_v14  ;;  %v340_v58 = vrot.slane %v335_v55, %v980_v13  ;;  %p811_p12 = scmp.ne.s32.totalorder %s532_s7, %s810_s15  ;;  %p816_p0 = scmp.lt.s32.totalorder %s810_s15, %s810_s15 }
  0x6b   :  { %607 = vmatprep.subr.bf16.mxu0 %v849_v0  ;;  %627 = vmatprep.subr.bf16.mxu1 %v849_v0 }
  0x6c   :  { %p817_p1 = por %p816_p0, %p815_p13 }
  0x6e   :  { %608 = vmatpush3.bf16.msra.mxu0 %v656_v8  ;;  %628 = vmatpush3.bf16.msra.mxu1 %v664_v19  ;;  %p818_p2 = pnand %p817_p1, %p811_p12 }
  0x6f   :  { %609 = vmatprep.subr.bf16.mxu0 %v849_v0  ;;  %629 = vmatprep.subr.bf16.mxu1 %v849_v0 }
  0x72   :  { %610 = vmatpush3.bf16.msra.mxu0 %v657_v11  ;;  %630 = vmatpush3.bf16.msra.mxu1 %v665_v23  ;;  %v509_v11 = vrot.slane %v496_v10, %v980_v13  ;;  %v364_v23 = vrot.slane %v359_v1, %v980_v13 }
  0x73   :  { %611 = vmatprep.subr.bf16.mxu0 %v849_v0  ;;  %631 = vmatprep.subr.bf16.mxu1 %v849_v0 }
  0x76   :  { %612 = vmatpush3.bf16.msra.mxu0 %v658_v16  ;;  %632 = vmatpush3.bf16.msra.mxu1 %v666_v25 }
  0x77   :  { %613 = vmatprep.subr.bf16.mxu0 %v849_v0  ;;  %633 = vmatprep.subr.bf16.mxu1 %v849_v0  ;;  %v367_v0 = vsub.s32 1, %v975_v9 }
  0x79   :  { %v368_v2 = vrot.slane %v359_v1, %v367_v0 }
  0x7a   :  { %614 = vmatpush3.bf16.msra.mxu0 %v659_v22  ;;  %634 = vmatpush3.bf16.msra.mxu1 %v667_v26 }
  0x7b   :  { %451 = vmatprep.subr.bf16.mxu0 %v670_v29 }
  0x7d   :  { %616 = vmatmul.mubr.bf16.vlgmr.msra.gmra.mrb[0].mxu0 %v110_v24 }
  0x7e   :  { %483 = vmatprep.mubr.bf16.mxu0 %v851_v27  ;;  %452 = vmatpush1.bf16.msra.mxu0 %v668_v28 }
  0x7f   :  { %453 = vmatprep.subr.bf16.mxu0 %v673_v30 }
  0x82   :  { %454 = vmatpush1.bf16.msra.mxu0 %v671_v31 }
  0x83   :  { %455 = vmatprep.subr.bf16.mxu0 %v676_v32 }
  0x86   :  { %456 = vmatpush1.bf16.msra.mxu0 %v674_v33 }
  0x87   :  { %457 = vmatprep.subr.bf16.mxu0 %v679_v34 }
  0x8a   :  { %458 = vmatpush1.bf16.msra.mxu0 %v677_v35 }
  0x8b   :  { %459 = vmatprep.subr.bf16.mxu0 %v682_v36 }
  0x8e   :  { %460 = vmatpush1.bf16.msra.mxu0 %v680_v37 }
  0x8f   :  { %461 = vmatprep.subr.bf16.mxu0 %v685_v38 }
  0x92   :  { %462 = vmatpush1.bf16.msra.mxu0 %v683_v39 }
  0x93   :  { %463 = vmatprep.subr.bf16.mxu0 %v688_v50 }
  0x96   :  { %464 = vmatpush1.bf16.msra.mxu0 %v686_v51 }
  0x97   :  { %465 = vmatprep.subr.bf16.mxu0 %v691_v52 }
  0x9a   :  { %466 = vmatpush1.bf16.msra.mxu0 %v689_v53 }
 0x150   :  { %v209_v42 = vpop.f32.mrb[0].mxu0 }
 0x151   :  { %v617_v43 = vpop.f32.mrb[1].mxu0 }
 0x152   :  { %v212_v45 = vpop.f32.mrb[2].mxu0 }
 0x153   :  { %v216_v46 = vpack.c.bf16 %v212_v45, %v209_v42  ;;  %v618_v47 = vpop.f32.mrb[3].mxu0 }
 0x155   :  { %v225_v48 = vadd.bf16 %v224_v44, %v216_v46 }
 0x157   :  { %v226_v49 = vmax.bf16 %v851_v27, %v225_v48 }
 0x159   :  { %636 = vmatmul.mubr.bf16.vlgmr.msra.gmra.mrb[0].mxu1 %v226_v49 }
 0x22c   :  { %v325_v56 = vpop.f32.mrb[0].mxu1 }
 0x22d   :  { %v637_v57 = vpop.f32.mrb[1].mxu1 }
 0x22e   :  { %v328_v59 = vpop.f32.mrb[2].mxu1 }
 0x22f   :  { %v332_v60 = vpack.c.bf16 %v328_v59, %v325_v56  ;;  %v638_v61 = vpop.f32.mrb[3].mxu1 }
 0x231   :  { %v341_v62 = vadd.bf16 %v340_v58, %v332_v60 }
 0x233   :  { %v342_v63 = vmax.bf16 %v851_v27, %v341_v62 }
 0x235   :  { %484 = vmatmul.mubr.bf16.vlgmr.msra.gmra.mrb[4].mxu0 %v342_v63 }
 0x308   :  { %v485_v3 = vpop.f32.mrb[4].mxu0 }
 0x309   :  { %v487_v4 = vpop.f32.mrb[5].mxu0  ;;  %v486_v25 = vadd.f32 %v485_v3, %v364_v23 }
 0x30a   :  { %v488_v5 = vadd.f32 %v487_v4, %v368_v2  ;;  %v489_v6 = vpop.f32.mrb[6].mxu0 }
 0x30b   :  { %v491_v7 = vpop.f32.mrb[7].mxu0  ;;  %v490_v12 = vadd.f32 %v489_v6, %v364_v23 }
 0x30c   :  { %692 = vtanh.f32 %v488_v5  ;;  %v492_v8 = vadd.f32 %v491_v7, %v368_v2 }
 0x30e   :  { %694 = vtanh.f32 %v492_v8 }
 0x316   :  { %v693_v14 = vpop.eup %692 }
 0x317   :  { %v497_v15 = vmul.f32 1.442695, %v693_v14  ;;  %v517_v9 = vmul.f32 %v693_v14, %v509_v11 }
 0x318   :  { %v695_v16 = vpop.eup %694 }
 0x319   :  { %696 = vpow2.f32 %v497_v15  ;;  %v499_v19 = vmul.f32 1.442695, %v695_v16  ;;  %519 = vadd.xlane.f32.xlu0 %v517_v9  ;;  %v518_v22 = vmul.f32 %v695_v16, %v509_v11 }
 0x31b   :  { %698 = vpow2.f32 %v499_v19 }
 0x31d   :  { %521 = vadd.xlane.f32.xlu0 %v518_v22 }
 0x323   :  { %v697_v24 = vpop.eup %696 }
 0x324   :  { %v501_v26 = vmul.f32 %v697_v24, %v984_v17 }
 0x325   :  { %v699_v27 = vpop.eup %698 }
 0x326   :  { %v502_v28 = vmul.f32 %v699_v27, %v986_v18  ;;  %v503_v29 = vadd.f32 %v501_v26, %v486_v25 }
 0x328   :  { %v504_v30 = vadd.f32 %v502_v28, %v490_v12  ;;  %v511_v31 = vmul.f32 %v509_v11, %v503_v29 }
 0x32a   :  { %v512_v32 = vmul.f32 %v509_v11, %v504_v30  ;;  %v513_v33 = vadd.f32 %v511_v31, %v989_v20 }
 0x32c   :  { %v514_v34 = vadd.f32 %v512_v32, %v992_v21  ;;  %515 = vst [vmem:[#allocation11] sm:$0xff] %v513_v33 }
 0x32e   :  { %516 = vst [vmem:[#allocation11 + $0x8] sm:$0xff] %v514_v34 }
 0x32f   :  { %821 = shalt.err (!%p818_p2)
}
 0x330   :  { %s822_s18 = scalar_lea.hbm %s1044_s8, 256 }
 0x331   :  { %p823_p3 = scmp.ne.s32.totalorder %s1044_s8, %s822_s18  ;;  %p826_p4 = scmp.lt.u32.totalorder %s822_s18, %s1044_s8 }
 0x333   :  { %p828_p5 = pnand %p826_p4, %p823_p3 }
 0x335   :  { %831 = shalt.err (!%p828_p5)
}
 0x336   :  { %537 = dma.vmem_to_hbm [thread:$0]  %s532_s7, 256, %s1044_s8, [#allocation4], %s841_s19, %s841_s19, %s842_s20   ;;  %vm523_vm1 = vcmask 7168  }
 0x3a6   :  { %v520_v13 = vpop.xlane.xlu0 %519 }
 0x3a7   :  { %524 = vst.msk [vmem:[%s1045_s9] sm:$0xff] %vm523_vm1, %v520_v13 }
 0x3aa   :  { %v522_v17 = vpop.xlane.xlu0 %521 }
 0x3ab   :  { %525 = vst.msk [vmem:[%s1045_s9 + $0x8] sm:$0xff] %vm523_vm1, %v522_v17 }
 0x3ac   :  { %838 = dma.done.wait [#allocation4], 256  }
 0x3ad   :  { %839 = vsyncadd [#allocation4], 4294967040 }
 0x3ae   :  { %545 = vsyncpa [#allocation3], 1 }
 0x3af   :  { %546 = vsyncpa [#allocation6], 1 }
 0x3b0   :  { %547 = vsyncpa [#allocation9], 1 }
 0x3b1   :  { %548 = vsyncpa [#allocation4], 1 }

</bundles_post_ra>
